<compile_context>
chip_gen: v6e
topology: v6e:2x2x1
jax: 0.10.0
libtpu: 0.0.40
codegen_flags: <defaults>
</compile_context>

<pallas_src>
import jax
import jax.numpy as jnp
from jax.experimental import pallas as pl
from jax.experimental.pallas import tpu as pltpu


PATCH_K = 48        # 3 channels * 4 * 4
PATCH_K_PAD = 64    # padded K for the first matmul
POS_PER_IMG = 64    # 8 x 8 output positions of the stride-4 conv
HID = 128
MID = 32
OUT_PAD = 128       # lane-dense output width (logits live in lanes 0..2)


def _leaky(x, slope=0.1):
    return jnp.where(x >= 0, x, slope * x)


def classifier_kernel(p_ref, w1_ref, b1_ref, w2_ref, b2_ref, w3_ref, b3_ref,
                      w4_ref, b4_ref, w5_ref, b5_ref, wl_ref, bl_ref, o_ref):
    # p_ref: (B*64, 64) bf16 -- B images, 64 patch rows each, (c,kh,kw) features.
    bf16 = jnp.bfloat16
    f32 = jnp.float32

    h = p_ref[...]
    # Conv2d(3,128,4,4) as a matmul over flattened patches + LeakyReLU(0.1)
    h = _leaky(jnp.dot(h, w1_ref[...], preferred_element_type=f32) + b1_ref[...])
    # Three 1x1 convs == per-position matmuls over channels
    h = _leaky(jnp.dot(h.astype(bf16), w2_ref[...], preferred_element_type=f32) + b2_ref[...])
    h = _leaky(jnp.dot(h.astype(bf16), w3_ref[...], preferred_element_type=f32) + b3_ref[...])
    h = _leaky(jnp.dot(h.astype(bf16), w4_ref[...], preferred_element_type=f32) + b4_ref[...])

    # AvgPool2d(8): mean over the 64 spatial rows of each image.  Pooling before
    # the last (activation-free) 1x1 conv is exact because both are linear.
    B = o_ref.shape[0]
    pooled = jnp.mean(h.reshape(B, POS_PER_IMG, HID), axis=1)          # (B, 128) f32

    # Conv2d(128,32,1), no activation, now at M=B
    h5 = jnp.dot(pooled.astype(bf16), w5_ref[...],
                 preferred_element_type=f32) + b5_ref[...]             # (B, 32)

    # Linear(32,3), zero-padded to 128 lanes for a dense store
    o_ref[...] = (jnp.dot(h5.astype(bf16), wl_ref[...],
                          preferred_element_type=f32) + bl_ref[...])   # (B, 128)


def extract_patches(x):
    """x: (N,3,32,32) NCHW -> (N*64, 48); patch vector ordered (c, kh, kw)."""
    N, C, H, W = x.shape
    assert C == 3 and H % 4 == 0 and W % 4 == 0
    Ho, Wo = H // 4, W // 4
    xp = x.reshape(N, C, Ho, 4, Wo, 4).transpose(0, 2, 4, 1, 3, 5)
    return xp.reshape(N * Ho * Wo, C * 16)


def prepare_params(params):
    """Pad / cast the logical parameters for the kernel."""
    (w1, b1, w2, b2, w3, b3, w4, b4, w5, b5, wl, bl) = params
    bf16 = jnp.bfloat16
    f32 = jnp.float32
    w1p = jnp.zeros((PATCH_K_PAD, HID), f32).at[:PATCH_K].set(w1).astype(bf16)
    wlp = jnp.zeros((MID, OUT_PAD), f32).at[:, :3].set(wl).astype(bf16)
    blp = jnp.zeros((1, OUT_PAD), f32).at[:, :3].set(bl)
    return (w1p, b1.astype(f32),
            w2.astype(bf16), b2.astype(f32),
            w3.astype(bf16), b3.astype(f32),
            w4.astype(bf16), b4.astype(f32),
            w5.astype(bf16), b5.astype(f32),
            wlp, blp)


def classifier_forward(x, params, *, block_images=32):
    N = x.shape[0]
    B = max(1, min(block_images, N))          # images per grid step
    n_blocks = (N + B - 1) // B
    Npad = n_blocks * B

    patches = extract_patches(x)                                      # (N*64, 48) f32
    patches = jnp.pad(patches, ((0, (Npad - N) * POS_PER_IMG),
                                (0, PATCH_K_PAD - PATCH_K)))
    patches = patches.astype(jnp.bfloat16)                            # (Npad*64, 64) bf16

    prepped = prepare_params(params)
    full = lambda a: pl.BlockSpec(a.shape, lambda g: (0, 0))

    M = Npad * POS_PER_IMG
    flops = (2 * M * PATCH_K_PAD * HID          # layer 1
             + 3 * 2 * M * HID * HID            # layers 2-4
             + 2 * Npad * HID * MID             # 128 -> 32
             + 2 * Npad * MID * OUT_PAD)        # 32 -> 3 (padded)
    bytes_accessed = (patches.size * 2
                      + sum(int(p.size) * p.dtype.itemsize for p in prepped)
                      + Npad * OUT_PAD * 4)
    cost = pl.CostEstimate(flops=flops, transcendentals=0,
                           bytes_accessed=bytes_accessed)

    out = pl.pallas_call(
        classifier_kernel,
        out_shape=jax.ShapeDtypeStruct((Npad, OUT_PAD), jnp.float32),
        grid_spec=pltpu.PrefetchScalarGridSpec(
            num_scalar_prefetch=0,
            grid=(n_blocks,),
            in_specs=[
                pl.BlockSpec((B * POS_PER_IMG, PATCH_K_PAD), lambda g: (g, 0)),
                full(prepped[0]), full(prepped[1]),
                full(prepped[2]), full(prepped[3]),
                full(prepped[4]), full(prepped[5]),
                full(prepped[6]), full(prepped[7]),
                full(prepped[8]), full(prepped[9]),
                full(prepped[10]), full(prepped[11]),
            ],
            out_specs=pl.BlockSpec((B, OUT_PAD), lambda g: (g, 0)),
        ),
        compiler_params=pltpu.CompilerParams(
            dimension_semantics=("parallel",)),
        cost_estimate=cost,
    )(patches, *prepped)
    return out[:N, :3]


def init_params(key):
    ks = jax.random.split(key, 12)

    def w(k, shape, scale):
        return scale * jax.random.normal(k, shape, dtype=jnp.float32)

    # Conv2d(3,128,4,4) flattened to (48,128); 1x1 convs as (Cin,Cout); Linear as (32,3).
    w1 = w(ks[0], (PATCH_K, HID), 0.05); b1 = jnp.zeros((1, HID), jnp.float32)
    w2 = w(ks[1], (HID, HID), 0.02);     b2 = jnp.zeros((1, HID), jnp.float32)
    w3 = w(ks[2], (HID, HID), 0.02);     b3 = jnp.zeros((1, HID), jnp.float32)
    w4 = w(ks[3], (HID, HID), 0.02);     b4 = jnp.zeros((1, HID), jnp.float32)
    w5 = w(ks[4], (HID, MID), 0.02);     b5 = w(ks[5], (1, MID), 0.01)
    wl = w(ks[6], (MID, 3), 0.1);        bl = w(ks[7], (1, 3), 0.01)
    return (w1, b1, w2, b2, w3, b3, w4, b4, w5, b5, wl, bl)


def reference_forward(x, params):
    """Pure-JAX reference mirroring the kernel's bf16-matmul / f32-accumulate math."""
    (w1, b1, w2, b2, w3, b3, w4, b4, w5, b5, wl, bl) = params
    bf16 = jnp.bfloat16
    f32 = jnp.float32
    N = x.shape[0]
    h = extract_patches(x).astype(bf16)                               # (N*64, 48)
    h = _leaky(jnp.dot(h, w1.astype(bf16), preferred_element_type=f32) + b1)
    h = _leaky(jnp.dot(h.astype(bf16), w2.astype(bf16), preferred_element_type=f32) + b2)
    h = _leaky(jnp.dot(h.astype(bf16), w3.astype(bf16), preferred_element_type=f32) + b3)
    h = _leaky(jnp.dot(h.astype(bf16), w4.astype(bf16), preferred_element_type=f32) + b4)
    pooled = h.reshape(N, POS_PER_IMG, HID).mean(axis=1)              # AvgPool2d(8)
    h5 = jnp.dot(pooled.astype(bf16), w5.astype(bf16), preferred_element_type=f32) + b5
    return jnp.dot(h5.astype(bf16), wl.astype(bf16), preferred_element_type=f32) + bl


if __name__ == "__main__":
    key = jax.random.PRNGKey(0)
    kx, kp = jax.random.split(key)
    # (N,3,32,32): 3 channels for Conv2d(3,...), 32x32 so stride-4 conv -> 8x8
    # and AvgPool2d(8) -> 1x1, matching view(-1, 32).
    x = jax.random.normal(kx, (2, 3, 32, 32), dtype=jnp.float32)
    params = init_params(kp)

    out = classifier_forward(x, params)
    out = jax.block_until_ready(out)

    ref = reference_forward(x, params)
    assert out.shape == (2, 3), out.shape
    assert jnp.allclose(out, ref, atol=1e-3, rtol=1e-3), (out, ref)
    print("KERNEL_OK")
</pallas_src>

<mosaic_0001>
module attributes {stable_mosaic.version = 11 : i64} {
  func.func @classifier_kernel(%arg0: i32, %arg1: memref<128x64xbf16, #tpu.memory_space<vmem>>, %arg2: memref<64x128xbf16, #tpu.memory_space<vmem>>, %arg3: memref<1x128xf32, #tpu.memory_space<vmem>>, %arg4: memref<128x128xbf16, #tpu.memory_space<vmem>>, %arg5: memref<1x128xf32, #tpu.memory_space<vmem>>, %arg6: memref<128x128xbf16, #tpu.memory_space<vmem>>, %arg7: memref<1x128xf32, #tpu.memory_space<vmem>>, %arg8: memref<128x128xbf16, #tpu.memory_space<vmem>>, %arg9: memref<1x128xf32, #tpu.memory_space<vmem>>, %arg10: memref<128x32xbf16, #tpu.memory_space<vmem>>, %arg11: memref<1x32xf32, #tpu.memory_space<vmem>>, %arg12: memref<32x128xbf16, #tpu.memory_space<vmem>>, %arg13: memref<1x128xf32, #tpu.memory_space<vmem>>, %arg14: memref<2x128xf32, #tpu.memory_space<vmem>>) attributes {dimension_semantics = [#tpu.dimension_semantics<parallel>], iteration_bounds = array<i64: 1>, scalar_prefetch = 0 : i64, scratch_operands = 0 : i64, tpu.core_type = #tpu.core_type<tc>, window_params = [{transform_indices = @transform_0, window_bounds = array<i64: 128, 64>}, {pipeline_mode = #tpu.pipeline_mode<synchronous>, transform_indices = @transform_1, window_bounds = array<i64: 64, 128>}, {pipeline_mode = #tpu.pipeline_mode<synchronous>, transform_indices = @transform_2, window_bounds = array<i64: 1, 128>}, {pipeline_mode = #tpu.pipeline_mode<synchronous>, transform_indices = @transform_3, window_bounds = array<i64: 128, 128>}, {pipeline_mode = #tpu.pipeline_mode<synchronous>, transform_indices = @transform_4, window_bounds = array<i64: 1, 128>}, {pipeline_mode = #tpu.pipeline_mode<synchronous>, transform_indices = @transform_5, window_bounds = array<i64: 128, 128>}, {pipeline_mode = #tpu.pipeline_mode<synchronous>, transform_indices = @transform_6, window_bounds = array<i64: 1, 128>}, {pipeline_mode = #tpu.pipeline_mode<synchronous>, transform_indices = @transform_7, window_bounds = array<i64: 128, 128>}, {pipeline_mode = #tpu.pipeline_mode<synchronous>, transform_indices = @transform_8, window_bounds = array<i64: 1, 128>}, {pipeline_mode = #tpu.pipeline_mode<synchronous>, transform_indices = @transform_9, window_bounds = array<i64: 128, 32>}, {pipeline_mode = #tpu.pipeline_mode<synchronous>, transform_indices = @transform_10, window_bounds = array<i64: 1, 32>}, {pipeline_mode = #tpu.pipeline_mode<synchronous>, transform_indices = @transform_11, window_bounds = array<i64: 32, 128>}, {pipeline_mode = #tpu.pipeline_mode<synchronous>, transform_indices = @transform_12, window_bounds = array<i64: 1, 128>}, {transform_indices = @transform_13, window_bounds = array<i64: 2, 128>}]} {
    %c0 = arith.constant 0 : index
    %c0_0 = arith.constant 0 : index
    %0 = vector.load %arg1[%c0, %c0_0] : memref<128x64xbf16, #tpu.memory_space<vmem>>, vector<128x64xbf16>
    %c0_1 = arith.constant 0 : index
    %c0_2 = arith.constant 0 : index
    %1 = vector.load %arg2[%c0_1, %c0_2] : memref<64x128xbf16, #tpu.memory_space<vmem>>, vector<64x128xbf16>
    %cst = arith.constant dense<0.000000e+00> : vector<128x128xf32>
    %2 = tpu.matmul %0, %1, %cst {dimension_numbers = #tpu.dot_dimension_numbers<[1], [0], [0], [1], [0, 0, 1, 1], [], []>} : vector<128x64xbf16>, vector<64x128xbf16>, vector<128x128xf32> -> vector<128x128xf32>
    %c0_3 = arith.constant 0 : index
    %c0_4 = arith.constant 0 : index
    %3 = vector.load %arg3[%c0_3, %c0_4] : memref<1x128xf32, #tpu.memory_space<vmem>>, vector<1x128xf32>
    %4 = vector.broadcast %3 : vector<1x128xf32> to vector<128x128xf32>
    %5 = arith.addf %2, %4 : vector<128x128xf32>
    %cst_5 = arith.constant 0.000000e+00 : f32
    %6 = vector.broadcast %cst_5 : f32 to vector<128x128xf32>
    %7 = arith.cmpf oge, %5, %6 : vector<128x128xf32>
    %cst_6 = arith.constant 1.000000e-01 : f32
    %8 = vector.broadcast %cst_6 : f32 to vector<128x128xf32>
    %9 = arith.mulf %8, %5 : vector<128x128xf32>
    %10 = arith.select %7, %5, %9 : vector<128x128xi1>, vector<128x128xf32>
    %11 = arith.truncf %10 : vector<128x128xf32> to vector<128x128xbf16>
    %c0_7 = arith.constant 0 : index
    %c0_8 = arith.constant 0 : index
    %12 = vector.load %arg4[%c0_7, %c0_8] : memref<128x128xbf16, #tpu.memory_space<vmem>>, vector<128x128xbf16>
    %cst_9 = arith.constant dense<0.000000e+00> : vector<128x128xf32>
    %13 = tpu.matmul %11, %12, %cst_9 {dimension_numbers = #tpu.dot_dimension_numbers<[1], [0], [0], [1], [0, 0, 1, 1], [], []>} : vector<128x128xbf16>, vector<128x128xbf16>, vector<128x128xf32> -> vector<128x128xf32>
    %c0_10 = arith.constant 0 : index
    %c0_11 = arith.constant 0 : index
    %14 = vector.load %arg5[%c0_10, %c0_11] : memref<1x128xf32, #tpu.memory_space<vmem>>, vector<1x128xf32>
    %15 = vector.broadcast %14 : vector<1x128xf32> to vector<128x128xf32>
    %16 = arith.addf %13, %15 : vector<128x128xf32>
    %cst_12 = arith.constant 0.000000e+00 : f32
    %17 = vector.broadcast %cst_12 : f32 to vector<128x128xf32>
    %18 = arith.cmpf oge, %16, %17 : vector<128x128xf32>
    %cst_13 = arith.constant 1.000000e-01 : f32
    %19 = vector.broadcast %cst_13 : f32 to vector<128x128xf32>
    %20 = arith.mulf %19, %16 : vector<128x128xf32>
    %21 = arith.select %18, %16, %20 : vector<128x128xi1>, vector<128x128xf32>
    %22 = arith.truncf %21 : vector<128x128xf32> to vector<128x128xbf16>
    %c0_14 = arith.constant 0 : index
    %c0_15 = arith.constant 0 : index
    %23 = vector.load %arg6[%c0_14, %c0_15] : memref<128x128xbf16, #tpu.memory_space<vmem>>, vector<128x128xbf16>
    %cst_16 = arith.constant dense<0.000000e+00> : vector<128x128xf32>
    %24 = tpu.matmul %22, %23, %cst_16 {dimension_numbers = #tpu.dot_dimension_numbers<[1], [0], [0], [1], [0, 0, 1, 1], [], []>} : vector<128x128xbf16>, vector<128x128xbf16>, vector<128x128xf32> -> vector<128x128xf32>
    %c0_17 = arith.constant 0 : index
    %c0_18 = arith.constant 0 : index
    %25 = vector.load %arg7[%c0_17, %c0_18] : memref<1x128xf32, #tpu.memory_space<vmem>>, vector<1x128xf32>
    %26 = vector.broadcast %25 : vector<1x128xf32> to vector<128x128xf32>
    %27 = arith.addf %24, %26 : vector<128x128xf32>
    %cst_19 = arith.constant 0.000000e+00 : f32
    %28 = vector.broadcast %cst_19 : f32 to vector<128x128xf32>
    %29 = arith.cmpf oge, %27, %28 : vector<128x128xf32>
    %cst_20 = arith.constant 1.000000e-01 : f32
    %30 = vector.broadcast %cst_20 : f32 to vector<128x128xf32>
    %31 = arith.mulf %30, %27 : vector<128x128xf32>
    %32 = arith.select %29, %27, %31 : vector<128x128xi1>, vector<128x128xf32>
    %33 = arith.truncf %32 : vector<128x128xf32> to vector<128x128xbf16>
    %c0_21 = arith.constant 0 : index
    %c0_22 = arith.constant 0 : index
    %34 = vector.load %arg8[%c0_21, %c0_22] : memref<128x128xbf16, #tpu.memory_space<vmem>>, vector<128x128xbf16>
    %cst_23 = arith.constant dense<0.000000e+00> : vector<128x128xf32>
    %35 = tpu.matmul %33, %34, %cst_23 {dimension_numbers = #tpu.dot_dimension_numbers<[1], [0], [0], [1], [0, 0, 1, 1], [], []>} : vector<128x128xbf16>, vector<128x128xbf16>, vector<128x128xf32> -> vector<128x128xf32>
    %c0_24 = arith.constant 0 : index
    %c0_25 = arith.constant 0 : index
    %36 = vector.load %arg9[%c0_24, %c0_25] : memref<1x128xf32, #tpu.memory_space<vmem>>, vector<1x128xf32>
    %37 = vector.broadcast %36 : vector<1x128xf32> to vector<128x128xf32>
    %38 = arith.addf %35, %37 : vector<128x128xf32>
    %cst_26 = arith.constant 0.000000e+00 : f32
    %39 = vector.broadcast %cst_26 : f32 to vector<128x128xf32>
    %40 = arith.cmpf oge, %38, %39 : vector<128x128xf32>
    %cst_27 = arith.constant 1.000000e-01 : f32
    %41 = vector.broadcast %cst_27 : f32 to vector<128x128xf32>
    %42 = arith.mulf %41, %38 : vector<128x128xf32>
    %43 = arith.select %40, %38, %42 : vector<128x128xi1>, vector<128x128xf32>
    %44 = vector.shape_cast %43 : vector<128x128xf32> to vector<2x64x128xf32>
    %cst_28 = arith.constant dense<0.000000e+00> : vector<2x128xf32>
    %45 = vector.multi_reduction <add>, %44, %cst_28 [1] : vector<2x64x128xf32> to vector<2x128xf32>
    %cst_29 = arith.constant 6.400000e+01 : f32
    %46 = vector.broadcast %cst_29 : f32 to vector<2x128xf32>
    %47 = arith.divf %45, %46 : vector<2x128xf32>
    %48 = arith.truncf %47 : vector<2x128xf32> to vector<2x128xbf16>
    %c0_30 = arith.constant 0 : index
    %c0_31 = arith.constant 0 : index
    %49 = vector.load %arg10[%c0_30, %c0_31] : memref<128x32xbf16, #tpu.memory_space<vmem>>, vector<128x32xbf16>
    %cst_32 = arith.constant dense<0.000000e+00> : vector<2x32xf32>
    %50 = tpu.matmul %48, %49, %cst_32 {dimension_numbers = #tpu.dot_dimension_numbers<[1], [0], [0], [1], [0, 0, 1, 1], [], []>} : vector<2x128xbf16>, vector<128x32xbf16>, vector<2x32xf32> -> vector<2x32xf32>
    %c0_33 = arith.constant 0 : index
    %c0_34 = arith.constant 0 : index
    %51 = vector.load %arg11[%c0_33, %c0_34] : memref<1x32xf32, #tpu.memory_space<vmem>>, vector<1x32xf32>
    %52 = vector.broadcast %51 : vector<1x32xf32> to vector<2x32xf32>
    %53 = arith.addf %50, %52 : vector<2x32xf32>
    %54 = arith.truncf %53 : vector<2x32xf32> to vector<2x32xbf16>
    %c0_35 = arith.constant 0 : index
    %c0_36 = arith.constant 0 : index
    %55 = vector.load %arg12[%c0_35, %c0_36] : memref<32x128xbf16, #tpu.memory_space<vmem>>, vector<32x128xbf16>
    %cst_37 = arith.constant dense<0.000000e+00> : vector<2x128xf32>
    %56 = tpu.matmul %54, %55, %cst_37 {dimension_numbers = #tpu.dot_dimension_numbers<[1], [0], [0], [1], [0, 0, 1, 1], [], []>} : vector<2x32xbf16>, vector<32x128xbf16>, vector<2x128xf32> -> vector<2x128xf32>
    %c0_38 = arith.constant 0 : index
    %c0_39 = arith.constant 0 : index
    %57 = vector.load %arg13[%c0_38, %c0_39] : memref<1x128xf32, #tpu.memory_space<vmem>>, vector<1x128xf32>
    %58 = vector.broadcast %57 : vector<1x128xf32> to vector<2x128xf32>
    %59 = arith.addf %56, %58 : vector<2x128xf32>
    %c0_40 = arith.constant 0 : index
    %c0_41 = arith.constant 0 : index
    %60 = vector.load %arg14[%c0_40, %c0_41] : memref<2x128xf32, #tpu.memory_space<vmem>>, vector<2x128xf32>
    tpu.vector_store %arg14[%c0_40, %c0_41], %59 {strides = array<i32>} : memref<2x128xf32, #tpu.memory_space<vmem>>, vector<2x128xf32>,
    return
  }
  func.func @transform_0(%arg0: i32) -> (i32, i32) {
    %c0_i32 = arith.constant 0 : i32
    %c0_i32_0 = arith.constant 0 : i32
    return %arg0, %c0_i32 : i32, i32
  }
  func.func @transform_1(%arg0: i32) -> (i32, i32) {
    %c0_i32 = arith.constant 0 : i32
    %c0_i32_0 = arith.constant 0 : i32
    %c0_i32_1 = arith.constant 0 : i32
    return %c0_i32, %c0_i32_0 : i32, i32
  }
  func.func @transform_2(%arg0: i32) -> (i32, i32) {
    %c0_i32 = arith.constant 0 : i32
    %c0_i32_0 = arith.constant 0 : i32
    %c0_i32_1 = arith.constant 0 : i32
    return %c0_i32, %c0_i32_0 : i32, i32
  }
  func.func @transform_3(%arg0: i32) -> (i32, i32) {
    %c0_i32 = arith.constant 0 : i32
    %c0_i32_0 = arith.constant 0 : i32
    %c0_i32_1 = arith.constant 0 : i32
    return %c0_i32, %c0_i32_0 : i32, i32
  }
  func.func @transform_4(%arg0: i32) -> (i32, i32) {
    %c0_i32 = arith.constant 0 : i32
    %c0_i32_0 = arith.constant 0 : i32
    %c0_i32_1 = arith.constant 0 : i32
    return %c0_i32, %c0_i32_0 : i32, i32
  }
  func.func @transform_5(%arg0: i32) -> (i32, i32) {
    %c0_i32 = arith.constant 0 : i32
    %c0_i32_0 = arith.constant 0 : i32
    %c0_i32_1 = arith.constant 0 : i32
    return %c0_i32, %c0_i32_0 : i32, i32
  }
  func.func @transform_6(%arg0: i32) -> (i32, i32) {
    %c0_i32 = arith.constant 0 : i32
    %c0_i32_0 = arith.constant 0 : i32
    %c0_i32_1 = arith.constant 0 : i32
    return %c0_i32, %c0_i32_0 : i32, i32
  }
  func.func @transform_7(%arg0: i32) -> (i32, i32) {
    %c0_i32 = arith.constant 0 : i32
    %c0_i32_0 = arith.constant 0 : i32
    %c0_i32_1 = arith.constant 0 : i32
    return %c0_i32, %c0_i32_0 : i32, i32
  }
  func.func @transform_8(%arg0: i32) -> (i32, i32) {
    %c0_i32 = arith.constant 0 : i32
    %c0_i32_0 = arith.constant 0 : i32
    %c0_i32_1 = arith.constant 0 : i32
    return %c0_i32, %c0_i32_0 : i32, i32
  }
  func.func @transform_9(%arg0: i32) -> (i32, i32) {
    %c0_i32 = arith.constant 0 : i32
    %c0_i32_0 = arith.constant 0 : i32
    %c0_i32_1 = arith.constant 0 : i32
    return %c0_i32, %c0_i32_0 : i32, i32
  }
  func.func @transform_10(%arg0: i32) -> (i32, i32) {
    %c0_i32 = arith.constant 0 : i32
    %c0_i32_0 = arith.constant 0 : i32
    %c0_i32_1 = arith.constant 0 : i32
    return %c0_i32, %c0_i32_0 : i32, i32
  }
  func.func @transform_11(%arg0: i32) -> (i32, i32) {
    %c0_i32 = arith.constant 0 : i32
    %c0_i32_0 = arith.constant 0 : i32
    %c0_i32_1 = arith.constant 0 : i32
    return %c0_i32, %c0_i32_0 : i32, i32
  }
  func.func @transform_12(%arg0: i32) -> (i32, i32) {
    %c0_i32 = arith.constant 0 : i32
    %c0_i32_0 = arith.constant 0 : i32
    %c0_i32_1 = arith.constant 0 : i32
    return %c0_i32, %c0_i32_0 : i32, i32
  }
  func.func @transform_13(%arg0: i32) -> (i32, i32) {
    %c0_i32 = arith.constant 0 : i32
    %c0_i32_0 = arith.constant 0 : i32
    return %arg0, %c0_i32 : i32, i32
  }
}

</mosaic_0001>

<bundles_post_ra>
// kernel: tpu_custom_call.1
= control target key start
LH: loop header
LB: loop body
LE: loop exit
PB: predicated region body
PF: predicated region fallthrough
CT: control target
= control target key end

     0   :  { %18 = vsyncpa [#allocation3], 0  ;;  %s2023_s0 = inlined_call_operand.vmem [shape: bf16[128,64], index: 0, kind: input, shape index: {}]   ;;  %s2024_s1 = inlined_call_operand.vmem [shape: bf16[64,128], index: 1, kind: input, shape index: {}]   ;;  %s2025_s2 = inlined_call_operand.vmem [shape: f32[1,128], index: 2, kind: input, shape index: {}]   ;;  %s2026_s3 = inlined_call_operand.vmem [shape: bf16[128,128], index: 3, kind: input, shape index: {}]   ;;  %s2027_s4 = inlined_call_operand.vmem [shape: f32[1,128], index: 4, kind: input, shape index: {}]   ;;  %s2028_s5 = inlined_call_operand.vmem [shape: bf16[128,128], index: 5, kind: input, shape index: {}]   ;;  %s2029_s6 = inlined_call_operand.hbm [shape: f32[1,128], index: 6, kind: input, shape index: {}]   ;;  %s2030_s7 = inlined_call_operand.hbm [shape: bf16[128,128], index: 7, kind: input, shape index: {}]   ;;  %s2031_s8 = inlined_call_operand.hbm [shape: f32[1,128], index: 8, kind: input, shape index: {}]   ;;  %s2032_s9 = inlined_call_operand.vmem [shape: bf16[128,32], index: 9, kind: input, shape index: {}]   ;;  %s2033_s10 = inlined_call_operand.hbm [shape: f32[1,32], index: 10, kind: input, shape index: {}]   ;;  %s2034_s11 = inlined_call_operand.vmem [shape: bf16[32,128], index: 11, kind: input, shape index: {}]   ;;  %s2035_s12 = inlined_call_operand.vmem [shape: f32[1,128], index: 12, kind: input, shape index: {}]   ;;  %s2036_s13 = inlined_call_operand.hbm [shape: f32[2,128], index: 13, kind: output, shape index: {}]  }
   0x1   :  { %19 = vsyncpa [#allocation6], 0 }
   0x2   :  { %20 = vsyncpa [#allocation9], 0 }
   0x3   :  { %21 = vsyncpa [#allocation4], 0  ;;  %s1712_s25 = smov [#allocation5]  }
   0x4   :  { %s49_s26 = sshll.u32 %s1712_s25, 4  ;;  %s50_s26 = int_to_ptr.vmem [resolvable:$true] %s49_s26 }
   0x5   :  { %s1612_s27 = scalar_lea.vmem %s50_s26, 1024  ;;  %p1617_p1 = scmp.lt.s32.totalorder %s50_s26, %s50_s26 }
   0x6   :  { %p1613_p0 = scmp.ne.s32.totalorder %s50_s26, %s1612_s27  ;;  %p1618_p2 = scmp.lt.s32.totalorder %s1612_s27, %s1612_s27 }
   0x8   :  { %p1619_p3 = por %p1618_p2, %p1617_p1 }
   0xa   :  { %p1620_p4 = pnand %p1619_p3, %p1613_p0 }
   0xc   :  { %1623 = shalt.err (!%p1620_p4)
}
   0xd   :  { %s1713_s28 = smov 64   ;;  %s1714_s29 = smov 4  }
   0xe   :  { %55 = dma.hbm_to_vmem [thread:$0]  %s2030_s7, 1024, %s50_s26, [#allocation6], %s1713_s28, %s1713_s28, %s1714_s29  }
   0xf   :  { %s1715_s15 = smov [#allocation2]   ;;  %s1716_s17 = smov [#allocation7]  }
  0x10   :  { %s40_s16 = sshll.u32 %s1715_s15, 4  ;;  %s62_s18 = sshll.u32 %s1716_s17, 4  ;;  %s41_s16 = int_to_ptr.vmem [resolvable:$true] %s40_s16  ;;  %s63_s18 = int_to_ptr.vmem [resolvable:$true] %s62_s18 }
  0x11   :  { %s1632_s19 = scalar_lea.vmem %s41_s16, 16  ;;  %s1636_s20 = scalar_lea.vmem %s41_s16, 32 }
  0x12   :  { %p1633_p5 = scmp.ne.s32.totalorder %s41_s16, %s1632_s19  ;;  %p1637_p6 = scmp.lt.s32.totalorder %s41_s16, %s41_s16 }
  0x13   :  { %p1638_p7 = scmp.lt.s32.totalorder %s1636_s20, %s1632_s19 }
  0x15   :  { %p1639_p8 = por %p1638_p7, %p1637_p6 }
  0x17   :  { %p1640_p9 = pnand %p1639_p8, %p1633_p5 }
  0x19   :  { %1643 = shalt.err (!%p1640_p9)
}
  0x1a   :  { %43 = dma.hbm_to_vmem [thread:$0]  %s2029_s6, 16, %s41_s16, [#allocation3]  }
  0x1b   :  { %s1652_s23 = scalar_lea.vmem %s63_s18, 16  ;;  %s1656_s7 = scalar_lea.vmem %s63_s18, 32 }
  0x1c   :  { %p1653_p10 = scmp.ne.s32.totalorder %s63_s18, %s1652_s23  ;;  %p1657_p11 = scmp.lt.s32.totalorder %s63_s18, %s63_s18 }
  0x1d   :  { %p1658_p12 = scmp.lt.s32.totalorder %s1656_s7, %s1652_s23 }
  0x1f   :  { %p1659_p13 = por %p1658_p12, %p1657_p11 }
  0x21   :  { %p1660_p0 = pnand %p1659_p13, %p1653_p10 }
  0x23   :  { %1663 = shalt.err (!%p1660_p0)
}
  0x24   :  { %65 = dma.hbm_to_vmem [thread:$0]  %s2031_s8, 16, %s63_s18, [#allocation6]  }
  0x25   :  { %s1717_s26 = smov [#allocation8]  }
  0x26   :  { %s74_s27 = sshll.u32 %s1717_s26, 4  ;;  %s75_s27 = int_to_ptr.vmem [resolvable:$true] %s74_s27 }
  0x27   :  { %s1672_s28 = scalar_lea.vmem %s75_s27, 16  ;;  %s1676_s29 = scalar_lea.vmem %s75_s27, 32 }
  0x28   :  { %p1673_p1 = scmp.ne.s32.totalorder %s75_s27, %s1672_s28  ;;  %p1677_p2 = scmp.lt.s32.totalorder %s75_s27, %s75_s27 }
  0x29   :  { %p1678_p3 = scmp.lt.s32.totalorder %s1676_s29, %s1672_s28 }
  0x2b   :  { %p1679_p4 = por %p1678_p3, %p1677_p2 }
  0x2d   :  { %p1680_p5 = pnand %p1679_p4, %p1673_p1 }
  0x2f   :  { %1683 = shalt.err (!%p1680_p5)
}
  0x30   :  { %77 = dma.hbm_to_vmem [thread:$0]  %s2033_s10, 16, %s75_s27, [#allocation9]  }
  0x31   :  { %1704 = dma.done.wait [#allocation3], 16  }
  0x32   :  { %1705 = vsyncadd [#allocation3], 4294967280 }
  0x33   :  { %1706 = dma.done.wait [#allocation6], 1040  }
  0x34   :  { %1707 = vsyncadd [#allocation6], 4294966256 }
  0x35   :  { %1708 = dma.done.wait [#allocation9], 16  }
  0x36   :  { %1709 = vsyncadd [#allocation9], 4294967280  ;;  %v1558_v0 = vld [vmem:[%s2024_s1 + $0x18] sm:$0xff]   ;;  %v1559_v1 = vld [vmem:[%s2024_s1 + $0x10] sm:$0xff]   ;;  %vm190_vm0 = vcmask 523264   ;;  %s1720_s19 = smov [#allocation10]  }
  0x37   :  { %1401 = vmatprep.subr.bf16.mxu0 %v1558_v0  ;;  %v1560_v2 = vld [vmem:[%s2024_s1 + $0x8] sm:$0xff]   ;;  %v1562_v3 = vld [vmem:[%s2023_s0] sm:$0xff]   ;;  %v1570_v5 = vld [vmem:[%s2026_s3 + $0x38] sm:$0xff]   ;;  %s1257_s20 = sshll.u32 %s1720_s19, 4  ;;  %s1258_s20 = int_to_ptr.vmem [resolvable:$true] %s1257_s20 }
  0x38   :  { %1402 = vmatpush3.bf16.msra.mxu0 %v1558_v0  ;;  %1409 = vmatprep.mubr.msk.bf16.mxu0 %vm190_vm0, %v1562_v3  ;;  %v1561_v4 = vld [vmem:[%s2024_s1] sm:$0xff]   ;;  %v1571_v6 = vld [vmem:[%s2026_s3 + $0x30] sm:$0xff]   ;;  %v1563_v7 = vld [vmem:[%s2023_s0 + $0x8] sm:$0xff]   ;;  %p1689_p7 = scmp.lt.s32.totalorder %s1258_s20, %s1258_s20 }
  0x39   :  { %1403 = vmatprep.subr.bf16.mxu0 %v1559_v1  ;;  %1425 = vmatprep.subr.bf16.mxu1 %v1570_v5  ;;  %v1564_v8 = vld [vmem:[%s2023_s0 + $0x10] sm:$0xff]   ;;  %v1572_v9 = vld [vmem:[%s2026_s3 + $0x28] sm:$0xff]   ;;  %v1573_v10 = vld [vmem:[%s2026_s3 + $0x20] sm:$0xff]  }
  0x3a   :  { %1426 = vmatpush3.bf16.msra.mxu1 %v1570_v5  ;;  %v1565_v11 = vld [vmem:[%s2023_s0 + $0x18] sm:$0xff]   ;;  %v1566_v12 = vld [vmem:[%s2023_s0 + $0x20] sm:$0xff]   ;;  %v1567_v14 = vld [vmem:[%s2023_s0 + $0x28] sm:$0xff]  }
  0x3b   :  { %1427 = vmatprep.subr.bf16.mxu1 %v1571_v6  ;;  %v1574_v13 = vld [vmem:[%s2026_s3 + $0x18] sm:$0xff]   ;;  %v1568_v15 = vld [vmem:[%s2023_s0 + $0x30] sm:$0xff]   ;;  %v1576_v18 = vld [vmem:[%s2026_s3 + $0x8] sm:$0xff]  }
  0x3c   :  { %1404 = vmatpush3.bf16.msra.mxu0 %v1559_v1  ;;  %v1569_v16 = vld [vmem:[%s2023_s0 + $0x38] sm:$0xff]   ;;  %v1575_v17 = vld [vmem:[%s2026_s3 + $0x10] sm:$0xff]   ;;  %v1577_v19 = vld [vmem:[%s2026_s3] sm:$0xff]  }
  0x3d   :  { %1405 = vmatprep.subr.bf16.mxu0 %v1560_v2  ;;  %v1578_v20 = vld [vmem:[%s2028_s5 + $0x38] sm:$0xff]   ;;  %v1579_v21 = vld [vmem:[%s2028_s5 + $0x30] sm:$0xff]   ;;  %v1580_v22 = vld [vmem:[%s2028_s5 + $0x28] sm:$0xff]  }
  0x3e   :  { %1428 = vmatpush3.bf16.msra.mxu1 %v1571_v6  ;;  %v1581_v23 = vld [vmem:[%s2028_s5 + $0x20] sm:$0xff]   ;;  %v1582_v24 = vld [vmem:[%s2028_s5 + $0x18] sm:$0xff]  }
  0x3f   :  { %1429 = vmatprep.subr.bf16.mxu1 %v1572_v9  ;;  %v1889_v26 = vld [vmem:[%s2025_s2] ss:$0 sm:$0xff] }
  0x40   :  { %1406 = vmatpush3.bf16.msra.mxu0 %v1560_v2 }
  0x41   :  { %1407 = vmatprep.subr.bf16.mxu0 %v1561_v4 }
  0x42   :  { %1430 = vmatpush3.bf16.msra.mxu1 %v1572_v9 }
  0x43   :  { %1431 = vmatprep.subr.bf16.mxu1 %v1573_v10 }
  0x44   :  { %1408 = vmatpush3.bf16.msra.mxu0 %v1561_v4 }
  0x45   :  { %1457 = vmatprep.subr.bf16.mxu0 %v1578_v20 }
  0x46   :  { %1432 = vmatpush3.bf16.msra.mxu1 %v1573_v10 }
  0x47   :  { %1410 = vmatmul.mubr.msk.bf16.vlgmr.msra.gmra.mxu0 %vm190_vm0, %v1563_v7  ;;  %1433 = vmatprep.subr.bf16.mxu1 %v1574_v13 }
  0x48   :  { %1413 = vmatprep.mubr.msk.bf16.mxu0 %vm190_vm0, %v1564_v8  ;;  %1458 = vmatpush3.bf16.msra.mxu0 %v1578_v20 }
  0x49   :  { %1459 = vmatprep.subr.bf16.mxu0 %v1579_v21 }
  0x4a   :  { %1434 = vmatpush3.bf16.msra.mxu1 %v1574_v13 }
  0x4b   :  { %1435 = vmatprep.subr.bf16.mxu1 %v1575_v17 }
  0x4c   :  { %1460 = vmatpush3.bf16.msra.mxu0 %v1579_v21 }
  0x4d   :  { %1461 = vmatprep.subr.bf16.mxu0 %v1580_v22 }
  0x4e   :  { %1436 = vmatpush3.bf16.msra.mxu1 %v1575_v17 }
  0x4f   :  { %1414 = vmatmul.mubr.msk.bf16.gmra.mxu0 %vm190_vm0, %v1565_v11  ;;  %1437 = vmatprep.subr.bf16.mxu1 %v1576_v18 }
  0x50   :  { %1417 = vmatprep.mubr.msk.bf16.mxu0 %vm190_vm0, %v1566_v12  ;;  %1462 = vmatpush3.bf16.msra.mxu0 %v1580_v22 }
  0x51   :  { %1463 = vmatprep.subr.bf16.mxu0 %v1581_v23 }
  0x52   :  { %1438 = vmatpush3.bf16.msra.mxu1 %v1576_v18 }
  0x53   :  { %1439 = vmatprep.subr.bf16.mxu1 %v1577_v19 }
  0x54   :  { %1464 = vmatpush3.bf16.msra.mxu0 %v1581_v23 }
  0x55   :  { %1465 = vmatprep.subr.bf16.mxu0 %v1582_v24 }
  0x56   :  { %1440 = vmatpush3.bf16.msra.mxu1 %v1577_v19 }
  0x57   :  { %1418 = vmatmul.mubr.msk.bf16.gmra.mxu0 %vm190_vm0, %v1567_v14 }
  0x58   :  { %1421 = vmatprep.mubr.msk.bf16.mxu0 %vm190_vm0, %v1568_v15  ;;  %1466 = vmatpush3.bf16.msra.mxu0 %v1582_v24 }
  0x5f   :  { %1422 = vmatmul.mubr.msk.bf16.gmra.mxu0 %vm190_vm0, %v1569_v16 }
 0x107   :  { %v1411_v25 = vpop.f32.mrf.mxu0 }
 0x108   :  { %v258_v29 = vadd.f32 %v1411_v25, %v1889_v26 }
 0x109   :  { %v249_v27 = vpop.f32.mrf.mxu0 }
 0x10a   :  { %v250_v28 = vadd.f32 %v1889_v26, %v249_v27  ;;  %v330_v36 = vmul.f32 0.1, %v258_v29  ;;  %vm314_vm3 = vcmp.ge.f32.partialorder %v258_v29, 0.0 }
 0x10b   :  { %v1412_v30 = vpop.f32.mrf.mxu0 }
 0x10c   :  { %v261_v31 = vadd.f32 %v1412_v30, %v1889_v26  ;;  %v328_v33 = vmul.f32 0.1, %v250_v28  ;;  %vm312_vm2 = vcmp.ge.f32.partialorder %v250_v28, 0.0  ;;  %v346_v47 = vsel %vm314_vm3, %v258_v29, %v330_v36  ;;  %v1585_v36 = vld [vmem:[%s2028_s5] sm:$0xff]  }
 0x10d   :  { %v252_v32 = vpop.f32.mrf.mxu0 }
 0x10e   :  { %vm315_vm1 = vcmp.ge.f32.partialorder %v261_v31, 0.0  ;;  %v331_v34 = vmul.f32 0.1, %v261_v31  ;;  %v253_v35 = vadd.f32 %v1889_v26, %v252_v32  ;;  %v344_v42 = vsel %vm312_vm2, %v250_v28, %v328_v33 }
 0x10f   :  { %v1415_v37 = vpop.f32.mrf.mxu0 }
 0x110   :  { %v329_v38 = vmul.f32 0.1, %v253_v35  ;;  %vm313_vm4 = vcmp.ge.f32.partialorder %v253_v35, 0.0  ;;  %v347_v40 = vsel %vm315_vm1, %v261_v31, %v331_v34  ;;  %v274_v44 = vadd.f32 %v1415_v37, %v1889_v26  ;;  %v1586_v37 = vld [vmem:[#allocation5 + $0x38] sm:$0xff]  }
 0x111   :  { %v265_v39 = vpop.f32.mrf.mxu0  ;;  %v361_v49 = vpack.c.bf16 %v347_v40, %v346_v47  ;;  %1489 = vmatprep.subr.bf16.mxu1 %v1586_v37  ;;  %v1589_v40 = vld [vmem:[#allocation5 + $0x20] sm:$0xff]  }
 0x112   :  { %v266_v41 = vadd.f32 %v1889_v26, %v265_v39  ;;  %v345_v43 = vsel %vm313_vm4, %v253_v35, %v329_v38  ;;  %v334_v54 = vmul.f32 0.1, %v274_v44  ;;  %vm318_vm7 = vcmp.ge.f32.partialorder %v274_v44, 0.0  ;;  %v1583_v35 = vld [vmem:[%s2028_s5 + $0x10] sm:$0xff]  }
 0x113   :  { %v1416_v45 = vpop.f32.mrf.mxu0  ;;  %v360_v46 = vpack.c.bf16 %v345_v43, %v344_v42  ;;  %1467 = vmatprep.subr.bf16.mxu0 %v1583_v35  ;;  %v1587_v38 = vld [vmem:[#allocation5 + $0x30] sm:$0xff]   ;;  %v1588_v39 = vld [vmem:[#allocation5 + $0x28] sm:$0xff]   ;;  %v1919_v43 = vld [vmem:[%s2027_s4] ss:$0 sm:$0xff] }
 0x114   :  { %v277_v48 = vadd.f32 %v1416_v45, %v1889_v26  ;;  %v332_v51 = vmul.f32 0.1, %v266_v41  ;;  %vm316_vm6 = vcmp.ge.f32.partialorder %v266_v41, 0.0  ;;  %v350_v1 = vsel %vm318_vm7, %v274_v44, %v334_v54  ;;  %1468 = vmatpush3.bf16.msra.mxu0 %v1583_v35 }
 0x115   :  { %v268_v50 = vpop.f32.mrf.mxu0  ;;  %1441 = vmatprep.mubr.bf16.mxu1 %v360_v46 }
 0x116   :  { %vm319_vm5 = vcmp.ge.f32.partialorder %v277_v48, 0.0  ;;  %v335_v52 = vmul.f32 0.1, %v277_v48  ;;  %v269_v53 = vadd.f32 %v1889_v26, %v268_v50  ;;  %1442 = vmatmul.mubr.bf16.vlgmr.msra.gmra.mxu1 %v361_v49  ;;  %v348_v60 = vsel %vm316_vm6, %v266_v41, %v332_v51  ;;  %v1590_v41 = vld [vmem:[#allocation5 + $0x18] sm:$0xff]  }
 0x117   :  { %v1419_v55 = vpop.f32.mrf.mxu0  ;;  %1490 = vmatpush3.bf16.msra.mxu1 %v1586_v37 }
 0x118   :  { %vm317_vm8 = vcmp.ge.f32.partialorder %v269_v53, 0.0  ;;  %v333_v56 = vmul.f32 0.1, %v269_v53  ;;  %v351_v58 = vsel %vm319_vm5, %v277_v48, %v335_v52  ;;  %v290_v62 = vadd.f32 %v1419_v55, %v1889_v26  ;;  %1491 = vmatprep.subr.bf16.mxu1 %v1587_v38 }
 0x119   :  { %v281_v57 = vpop.f32.mrf.mxu0  ;;  %v363_v3 = vpack.c.bf16 %v351_v58, %v350_v1 }
 0x11a   :  { %v282_v59 = vadd.f32 %v1889_v26, %v281_v57  ;;  %v349_v61 = vsel %vm317_vm8, %v269_v53, %v333_v56  ;;  %v338_v8 = vmul.f32 0.1, %v290_v62  ;;  %vm322_vm11 = vcmp.ge.f32.partialorder %v290_v62, 0.0 }
 0x11b   :  { %v1420_v63 = vpop.f32.mrf.mxu0  ;;  %v362_v0 = vpack.c.bf16 %v349_v61, %v348_v60  ;;  %1492 = vmatpush3.bf16.msra.mxu1 %v1587_v38 }
 0x11c   :  { %v293_v2 = vadd.f32 %v1420_v63, %v1889_v26  ;;  %v336_v5 = vmul.f32 0.1, %v282_v59  ;;  %vm320_vm10 = vcmp.ge.f32.partialorder %v282_v59, 0.0  ;;  %v354_v19 = vsel %vm322_vm11, %v290_v62, %v338_v8  ;;  %1493 = vmatprep.subr.bf16.mxu1 %v1588_v39 }
 0x11d   :  { %v284_v4 = vpop.f32.mrf.mxu0  ;;  %1445 = vmatprep.mubr.bf16.mxu1 %v362_v0 }
 0x11e   :  { %vm323_vm9 = vcmp.ge.f32.partialorder %v293_v2, 0.0  ;;  %v339_v6 = vmul.f32 0.1, %v293_v2  ;;  %v285_v7 = vadd.f32 %v1889_v26, %v284_v4  ;;  %1446 = vmatmul.mubr.bf16.gmra.mxu1 %v363_v3  ;;  %v352_v14 = vsel %vm320_vm10, %v282_v59, %v336_v5 }
 0x11f   :  { %v1423_v9 = vpop.f32.mrf.mxu0  ;;  %1494 = vmatpush3.bf16.msra.mxu1 %v1588_v39 }
 0x120   :  { %vm321_vm12 = vcmp.ge.f32.partialorder %v285_v7, 0.0  ;;  %v337_v10 = vmul.f32 0.1, %v285_v7  ;;  %v355_v12 = vsel %vm323_vm9, %v293_v2, %v339_v6  ;;  %v306_v16 = vadd.f32 %v1423_v9, %v1889_v26  ;;  %1495 = vmatprep.subr.bf16.mxu1 %v1589_v40 }
 0x121   :  { %v297_v11 = vpop.f32.mrf.mxu0  ;;  %v365_v21 = vpack.c.bf16 %v355_v12, %v354_v19 }
 0x122   :  { %v298_v13 = vadd.f32 %v1889_v26, %v297_v11  ;;  %v353_v15 = vsel %vm321_vm12, %v285_v7, %v337_v10  ;;  %v342_v27 = vmul.f32 0.1, %v306_v16  ;;  %vm326_vm15 = vcmp.ge.f32.partialorder %v306_v16, 0.0 }
 0x123   :  { %v1424_v17 = vpop.f32.mrf.mxu0  ;;  %v364_v18 = vpack.c.bf16 %v353_v15, %v352_v14  ;;  %1496 = vmatpush3.bf16.msra.mxu1 %v1589_v40 }
 0x124   :  { %v309_v20 = vadd.f32 %v1424_v17, %v1889_v26  ;;  %v340_v23 = vmul.f32 0.1, %v298_v13  ;;  %vm324_vm14 = vcmp.ge.f32.partialorder %v298_v13, 0.0  ;;  %v358_v33 = vsel %vm326_vm15, %v306_v16, %v342_v27  ;;  %1497 = vmatprep.subr.bf16.mxu1 %v1590_v41 }
 0x125   :  { %v300_v22 = vpop.f32.mrf.mxu0  ;;  %1449 = vmatprep.mubr.bf16.mxu1 %v364_v18 }
 0x126   :  { %vm327_vm13 = vcmp.ge.f32.partialorder %v309_v20, 0.0  ;;  %v343_v24 = vmul.f32 0.1, %v309_v20  ;;  %v301_v25 = vadd.f32 %v1889_v26, %v300_v22  ;;  %1450 = vmatmul.mubr.bf16.gmra.mxu1 %v365_v21  ;;  %v356_v30 = vsel %vm324_vm14, %v298_v13, %v340_v23  ;;  %v1584_v26 = vld [vmem:[%s2028_s5 + $0x8] sm:$0xff]  }
 0x127   :  { %1469 = vmatprep.subr.bf16.mxu0 %v1584_v26  ;;  %1498 = vmatpush3.bf16.msra.mxu1 %v1590_v41 }
 0x128   :  { %vm325_vm0 = vcmp.ge.f32.partialorder %v301_v25, 0.0  ;;  %v341_v28 = vmul.f32 0.1, %v301_v25  ;;  %v359_v29 = vsel %vm327_vm13, %v309_v20, %v343_v24  ;;  %1470 = vmatpush3.bf16.msra.mxu0 %v1584_v26 }
 0x129   :  { %v367_v34 = vpack.c.bf16 %v359_v29, %v358_v33  ;;  %1471 = vmatprep.subr.bf16.mxu0 %v1585_v36 }
 0x12a   :  { %v357_v31 = vsel %vm325_vm0, %v301_v25, %v341_v28 }
 0x12b   :  { %v366_v32 = vpack.c.bf16 %v357_v31, %v356_v30 }
 0x12c   :  { %1472 = vmatpush3.bf16.msra.mxu0 %v1585_v36 }
 0x12d   :  { %1453 = vmatprep.mubr.bf16.mxu1 %v366_v32 }
 0x12e   :  { %1454 = vmatmul.mubr.bf16.gmra.mxu1 %v367_v34 }
 0x1d6   :  { %v1443_v42 = vpop.f32.mrf.mxu1 }
 0x1d7   :  { %v482_v46 = vadd.f32 %v1443_v42, %v1919_v43 }
 0x1d8   :  { %v473_v44 = vpop.f32.mrf.mxu1 }
 0x1d9   :  { %v474_v45 = vadd.f32 %v1919_v43, %v473_v44  ;;  %v554_v53 = vmul.f32 0.1, %v482_v46  ;;  %vm538_vm3 = vcmp.ge.f32.partialorder %v482_v46, 0.0 }
 0x1da   :  { %v1444_v47 = vpop.f32.mrf.mxu1 }
 0x1db   :  { %v485_v48 = vadd.f32 %v1444_v47, %v1919_v43  ;;  %v552_v50 = vmul.f32 0.1, %v474_v45  ;;  %vm536_vm2 = vcmp.ge.f32.partialorder %v474_v45, 0.0  ;;  %v570_v61 = vsel %vm538_vm3, %v482_v46, %v554_v53  ;;  %v1592_v53 = vld [vmem:[#allocation5 + $0x8] sm:$0xff]  }
 0x1dc   :  { %v476_v49 = vpop.f32.mrf.mxu1 }
 0x1dd   :  { %vm539_vm1 = vcmp.ge.f32.partialorder %v485_v48, 0.0  ;;  %v555_v51 = vmul.f32 0.1, %v485_v48  ;;  %v477_v52 = vadd.f32 %v1919_v43, %v476_v49  ;;  %v568_v59 = vsel %vm536_vm2, %v474_v45, %v552_v50 }
 0x1de   :  { %v1447_v54 = vpop.f32.mrf.mxu1 }
 0x1df   :  { %vm537_vm4 = vcmp.ge.f32.partialorder %v477_v52, 0.0  ;;  %v553_v55 = vmul.f32 0.1, %v477_v52  ;;  %v571_v56 = vsel %vm539_vm1, %v485_v48, %v555_v51  ;;  %v498_v62 = vadd.f32 %v1447_v54, %v1919_v43 }
 0x1e0   :  { %v489_v57 = vpop.f32.mrf.mxu1  ;;  %v585_v1 = vpack.c.bf16 %v571_v56, %v570_v61 }
 0x1e1   :  { %v490_v58 = vadd.f32 %v1919_v43, %v489_v57  ;;  %v569_v60 = vsel %vm537_vm4, %v477_v52, %v553_v55  ;;  %v558_v7 = vmul.f32 0.1, %v498_v62  ;;  %vm542_vm7 = vcmp.ge.f32.partialorder %v498_v62, 0.0  ;;  %v1591_v52 = vld [vmem:[#allocation5 + $0x10] sm:$0xff]   ;;  %v1937_v55 = vld [vmem:[#allocation2] ss:$0 sm:$0xff] }
 0x1e2   :  { %v1448_v63 = vpop.f32.mrf.mxu1  ;;  %v584_v0 = vpack.c.bf16 %v569_v60, %v568_v59  ;;  %1499 = vmatprep.subr.bf16.mxu1 %v1591_v52 }
 0x1e3   :  { %v501_v2 = vadd.f32 %v1448_v63, %v1919_v43  ;;  %v556_v4 = vmul.f32 0.1, %v490_v58  ;;  %vm540_vm6 = vcmp.ge.f32.partialorder %v490_v58, 0.0  ;;  %v574_v18 = vsel %vm542_vm7, %v498_v62, %v558_v7  ;;  %1500 = vmatpush3.bf16.msra.mxu1 %v1591_v52 }
 0x1e4   :  { %v492_v3 = vpop.f32.mrf.mxu1  ;;  %1473 = vmatprep.mubr.bf16.mxu0 %v584_v0  ;;  %1501 = vmatprep.subr.bf16.mxu1 %v1592_v53 }
 0x1e5   :  { %vm543_vm5 = vcmp.ge.f32.partialorder %v501_v2, 0.0  ;;  %v559_v5 = vmul.f32 0.1, %v501_v2  ;;  %v493_v6 = vadd.f32 %v1919_v43, %v492_v3  ;;  %1474 = vmatmul.mubr.bf16.vlgmr.msra.gmra.mxu0 %v585_v1  ;;  %v572_v13 = vsel %vm540_vm6, %v490_v58, %v556_v4 }
 0x1e6   :  { %v1451_v8 = vpop.f32.mrf.mxu1 }
 0x1e7   :  { %vm541_vm8 = vcmp.ge.f32.partialorder %v493_v6, 0.0  ;;  %v557_v9 = vmul.f32 0.1, %v493_v6  ;;  %v575_v11 = vsel %vm543_vm5, %v501_v2, %v559_v5  ;;  %v514_v15 = vadd.f32 %v1451_v8, %v1919_v43  ;;  %1502 = vmatpush3.bf16.msra.mxu1 %v1592_v53 }
 0x1e8   :  { %v505_v10 = vpop.f32.mrf.mxu1  ;;  %v587_v20 = vpack.c.bf16 %v575_v11, %v574_v18 }
 0x1e9   :  { %v506_v12 = vadd.f32 %v1919_v43, %v505_v10  ;;  %v573_v14 = vsel %vm541_vm8, %v493_v6, %v557_v9  ;;  %v562_v25 = vmul.f32 0.1, %v514_v15  ;;  %vm546_vm11 = vcmp.ge.f32.partialorder %v514_v15, 0.0 }
 0x1ea   :  { %v1452_v16 = vpop.f32.mrf.mxu1  ;;  %v586_v17 = vpack.c.bf16 %v573_v14, %v572_v13 }
 0x1eb   :  { %v517_v19 = vadd.f32 %v1452_v16, %v1919_v43  ;;  %v560_v22 = vmul.f32 0.1, %v506_v12  ;;  %vm544_vm10 = vcmp.ge.f32.partialorder %v506_v12, 0.0  ;;  %v578_v36 = vsel %vm546_vm11, %v514_v15, %v562_v25 }
 0x1ec   :  { %v508_v21 = vpop.f32.mrf.mxu1  ;;  %1477 = vmatprep.mubr.bf16.mxu0 %v586_v17 }
 0x1ed   :  { %vm547_vm9 = vcmp.ge.f32.partialorder %v517_v19, 0.0  ;;  %v563_v23 = vmul.f32 0.1, %v517_v19  ;;  %v509_v24 = vadd.f32 %v1919_v43, %v508_v21  ;;  %1478 = vmatmul.mubr.bf16.gmra.mxu0 %v587_v20  ;;  %v576_v32 = vsel %vm544_vm10, %v506_v12, %v560_v22 }
 0x1ee   :  { %v1455_v27 = vpop.f32.mrf.mxu1 }
 0x1ef   :  { %vm545_vm12 = vcmp.ge.f32.partialorder %v509_v24, 0.0  ;;  %v561_v28 = vmul.f32 0.1, %v509_v24  ;;  %v579_v30 = vsel %vm547_vm9, %v517_v19, %v563_v23  ;;  %v530_v34 = vadd.f32 %v1455_v27, %v1919_v43 }
 0x1f0   :  { %v521_v29 = vpop.f32.mrf.mxu1  ;;  %v589_v38 = vpack.c.bf16 %v579_v30, %v578_v36 }
 0x1f1   :  { %v522_v31 = vadd.f32 %v1919_v43, %v521_v29  ;;  %v577_v33 = vsel %vm545_vm12, %v509_v24, %v561_v28  ;;  %v566_v44 = vmul.f32 0.1, %v530_v34  ;;  %vm550_vm15 = vcmp.ge.f32.partialorder %v530_v34, 0.0 }
 0x1f2   :  { %v1456_v35 = vpop.f32.mrf.mxu1  ;;  %v588_v26 = vpack.c.bf16 %v577_v33, %v576_v32 }
 0x1f3   :  { %v533_v37 = vadd.f32 %v1456_v35, %v1919_v43  ;;  %v564_v40 = vmul.f32 0.1, %v522_v31  ;;  %vm548_vm14 = vcmp.ge.f32.partialorder %v522_v31, 0.0  ;;  %v582_v50 = vsel %vm550_vm15, %v530_v34, %v566_v44 }
 0x1f4   :  { %v524_v39 = vpop.f32.mrf.mxu1  ;;  %1481 = vmatprep.mubr.bf16.mxu0 %v588_v26 }
 0x1f5   :  { %vm551_vm13 = vcmp.ge.f32.partialorder %v533_v37, 0.0  ;;  %v567_v41 = vmul.f32 0.1, %v533_v37  ;;  %v525_v42 = vadd.f32 %v1919_v43, %v524_v39  ;;  %1482 = vmatmul.mubr.bf16.gmra.mxu0 %v589_v38  ;;  %v580_v47 = vsel %vm548_vm14, %v522_v31, %v564_v40  ;;  %v1593_v43 = vld [vmem:[#allocation5] sm:$0xff]  }
 0x1f6   :  { %1503 = vmatprep.subr.bf16.mxu1 %v1593_v43 }
 0x1f7   :  { %vm549_vm0 = vcmp.ge.f32.partialorder %v525_v42, 0.0  ;;  %v565_v45 = vmul.f32 0.1, %v525_v42  ;;  %v583_v46 = vsel %vm551_vm13, %v533_v37, %v567_v41  ;;  %1504 = vmatpush3.bf16.msra.mxu1 %v1593_v43 }
 0x1f8   :  { %v591_v51 = vpack.c.bf16 %v583_v46, %v582_v50 }
 0x1f9   :  { %v581_v48 = vsel %vm549_vm0, %v525_v42, %v565_v45 }
 0x1fa   :  { %v590_v49 = vpack.c.bf16 %v581_v48, %v580_v47 }
 0x1fc   :  { %1485 = vmatprep.mubr.bf16.mxu0 %v590_v49 }
 0x1fd   :  { %1486 = vmatmul.mubr.bf16.gmra.mxu0 %v591_v51 }
 0x2a5   :  { %v1475_v54 = vpop.f32.mrf.mxu0 }
 0x2a6   :  { %v706_v58 = vadd.f32 %v1475_v54, %v1937_v55 }
 0x2a7   :  { %v697_v56 = vpop.f32.mrf.mxu0 }
 0x2a8   :  { %v698_v57 = vadd.f32 %v1937_v55, %v697_v56  ;;  %v778_v1 = vmul.f32 0.1, %v706_v58  ;;  %vm762_vm3 = vcmp.ge.f32.partialorder %v706_v58, 0.0 }
 0x2a9   :  { %v1476_v59 = vpop.f32.mrf.mxu0 }
 0x2aa   :  { %v709_v60 = vadd.f32 %v1476_v59, %v1937_v55  ;;  %v776_v62 = vmul.f32 0.1, %v698_v57  ;;  %vm760_vm2 = vcmp.ge.f32.partialorder %v698_v57, 0.0  ;;  %v794_v9 = vsel %vm762_vm3, %v706_v58, %v778_v1 }
 0x2ab   :  { %v700_v61 = vpop.f32.mrf.mxu0  ;;  %v1718_v1 = vmov 0.0  }
 0x2ac   :  { %vm763_vm1 = vcmp.ge.f32.partialorder %v709_v60, 0.0  ;;  %v779_v63 = vmul.f32 0.1, %v709_v60  ;;  %v701_v0 = vadd.f32 %v1937_v55, %v700_v61  ;;  %v792_v7 = vsel %vm760_vm2, %v698_v57, %v776_v62  ;;  %1521 = vmatprep.subr.bf16.mxu0 %v1718_v1 }
 0x2ad   :  { %v1479_v2 = vpop.f32.mrf.mxu0 }
 0x2ae   :  { %vm761_vm4 = vcmp.ge.f32.partialorder %v701_v0, 0.0  ;;  %v777_v3 = vmul.f32 0.1, %v701_v0  ;;  %v795_v4 = vsel %vm763_vm1, %v709_v60, %v779_v63  ;;  %v722_v10 = vadd.f32 %v1479_v2, %v1937_v55  ;;  %v1596_v2 = vld [vmem:[%s2032_s9 + $0x28] sm:$0xff]  }
 0x2af   :  { %v713_v5 = vpop.f32.mrf.mxu0  ;;  %v809_v13 = vpack.c.bf16 %v795_v4, %v794_v9  ;;  %v1598_v4 = vld [vmem:[%s2032_s9 + $0x18] sm:$0xff]   ;;  %vm1719_vm1 = vmmov 0   ;;  %v1990_v9 = vld [vmem:[#allocation7] ss:$0 sm:$0xff] }
 0x2b0   :  { %v714_v6 = vadd.f32 %v1937_v55, %v713_v5  ;;  %v793_v8 = vsel %vm761_vm4, %v701_v0, %v777_v3  ;;  %v782_v19 = vmul.f32 0.1, %v722_v10  ;;  %vm766_vm7 = vcmp.ge.f32.partialorder %v722_v10, 0.0  ;;  %v1594_v0 = vld [vmem:[%s2032_s9 + $0x38] sm:$0xff]   ;;  %v1597_v3 = vld [vmem:[%s2032_s9 + $0x20] sm:$0xff]   ;;  %v1599_v5 = vld [vmem:[%s2032_s9 + $0x10] sm:$0xff]   ;;  %1537 = vmatprep.mubr.msk.bf16.mxu0 %vm1719_vm1, %v1718_v1 }
 0x2b1   :  { %v1480_v11 = vpop.f32.mrf.mxu0  ;;  %v808_v12 = vpack.c.bf16 %v793_v8, %v792_v7  ;;  %1522 = vmatpush3.bf16.msra.mxu0 %v1594_v0  ;;  %v1601_v7 = vld [vmem:[%s2032_s9] sm:$0xff]  }
 0x2b2   :  { %v725_v14 = vadd.f32 %v1480_v11, %v1937_v55  ;;  %v780_v16 = vmul.f32 0.1, %v714_v6  ;;  %vm764_vm6 = vcmp.ge.f32.partialorder %v714_v6, 0.0  ;;  %v798_v31 = vsel %vm766_vm7, %v722_v10, %v782_v19  ;;  %1523 = vmatprep.subr.bf16.mxu0 %v1718_v1 }
 0x2b3   :  { %v716_v15 = vpop.f32.mrf.mxu0  ;;  %1505 = vmatprep.mubr.bf16.mxu1 %v808_v12 }
 0x2b4   :  { %vm767_vm5 = vcmp.ge.f32.partialorder %v725_v14, 0.0  ;;  %v783_v17 = vmul.f32 0.1, %v725_v14  ;;  %v717_v18 = vadd.f32 %v1937_v55, %v716_v15  ;;  %1506 = vmatmul.mubr.bf16.vlgmr.msra.gmra.mxu1 %v809_v13  ;;  %v796_v25 = vsel %vm764_vm6, %v714_v6, %v780_v16  ;;  %v1600_v6 = vld [vmem:[%s2032_s9 + $0x8] sm:$0xff]  }
 0x2b5   :  { %v1483_v20 = vpop.f32.mrf.mxu0 }
 0x2b6   :  { %vm765_vm8 = vcmp.ge.f32.partialorder %v717_v18, 0.0  ;;  %v781_v21 = vmul.f32 0.1, %v717_v18  ;;  %v799_v23 = vsel %vm767_vm5, %v725_v14, %v783_v17  ;;  %v738_v28 = vadd.f32 %v1483_v20, %v1937_v55 }
 0x2b7   :  { %v729_v22 = vpop.f32.mrf.mxu0  ;;  %v811_v33 = vpack.c.bf16 %v799_v23, %v798_v31 }
 0x2b8   :  { %v730_v24 = vadd.f32 %v1937_v55, %v729_v22  ;;  %v797_v27 = vsel %vm765_vm8, %v717_v18, %v781_v21  ;;  %v786_v37 = vmul.f32 0.1, %v738_v28  ;;  %vm770_vm11 = vcmp.ge.f32.partialorder %v738_v28, 0.0 }
 0x2b9   :  { %v1484_v29 = vpop.f32.mrf.mxu0  ;;  %v810_v30 = vpack.c.bf16 %v797_v27, %v796_v25 }
 0x2ba   :  { %v741_v32 = vadd.f32 %v1484_v29, %v1937_v55  ;;  %v784_v35 = vmul.f32 0.1, %v730_v24  ;;  %vm768_vm10 = vcmp.ge.f32.partialorder %v730_v24, 0.0  ;;  %v802_v49 = vsel %vm770_vm11, %v738_v28, %v786_v37 }
 0x2bb   :  { %v732_v34 = vpop.f32.mrf.mxu0  ;;  %1509 = vmatprep.mubr.bf16.mxu1 %v810_v30 }
 0x2bc   :  { %vm771_vm9 = vcmp.ge.f32.partialorder %v741_v32, 0.0  ;;  %v787_v26 = vmul.f32 0.1, %v741_v32  ;;  %v733_v36 = vadd.f32 %v1937_v55, %v732_v34  ;;  %1510 = vmatmul.mubr.bf16.gmra.mxu1 %v811_v33  ;;  %v800_v44 = vsel %vm768_vm10, %v730_v24, %v784_v35 }
 0x2bd   :  { %v1487_v38 = vpop.f32.mrf.mxu0 }
 0x2be   :  { %vm769_vm12 = vcmp.ge.f32.partialorder %v733_v36, 0.0  ;;  %v785_v39 = vmul.f32 0.1, %v733_v36  ;;  %v803_v41 = vsel %vm771_vm9, %v741_v32, %v787_v26  ;;  %v754_v46 = vadd.f32 %v1487_v38, %v1937_v55 }
 0x2bf   :  { %v745_v40 = vpop.f32.mrf.mxu0  ;;  %v813_v51 = vpack.c.bf16 %v803_v41, %v802_v49 }
 0x2c0   :  { %v746_v42 = vadd.f32 %v1937_v55, %v745_v40  ;;  %v801_v45 = vsel %vm769_vm12, %v733_v36, %v785_v39  ;;  %v790_v56 = vmul.f32 0.1, %v754_v46  ;;  %vm774_vm15 = vcmp.ge.f32.partialorder %v754_v46, 0.0 }
 0x2c1   :  { %v1488_v47 = vpop.f32.mrf.mxu0  ;;  %v812_v48 = vpack.c.bf16 %v801_v45, %v800_v44 }
 0x2c2   :  { %v757_v50 = vadd.f32 %v1488_v47, %v1937_v55  ;;  %v788_v53 = vmul.f32 0.1, %v746_v42  ;;  %vm772_vm14 = vcmp.ge.f32.partialorder %v746_v42, 0.0  ;;  %v806_v62 = vsel %vm774_vm15, %v754_v46, %v790_v56 }
 0x2c3   :  { %v748_v52 = vpop.f32.mrf.mxu0  ;;  %1513 = vmatprep.mubr.bf16.mxu1 %v812_v48 }
 0x2c4   :  { %vm775_vm13 = vcmp.ge.f32.partialorder %v757_v50, 0.0  ;;  %v791_v43 = vmul.f32 0.1, %v757_v50  ;;  %v749_v54 = vadd.f32 %v1937_v55, %v748_v52  ;;  %1514 = vmatmul.mubr.bf16.gmra.mxu1 %v813_v51  ;;  %v804_v59 = vsel %vm772_vm14, %v746_v42, %v788_v53  ;;  %v1595_v55 = vld [vmem:[%s2032_s9 + $0x30] sm:$0xff]  }
 0x2c5   :  { %1524 = vmatpush3.bf16.msra.mxu0 %v1595_v55 }
 0x2c6   :  { %vm773_vm0 = vcmp.ge.f32.partialorder %v749_v54, 0.0  ;;  %v789_v57 = vmul.f32 0.1, %v749_v54  ;;  %v807_v58 = vsel %vm775_vm13, %v757_v50, %v791_v43  ;;  %1525 = vmatprep.subr.bf16.mxu0 %v1718_v1 }
 0x2c7   :  { %v815_v63 = vpack.c.bf16 %v807_v58, %v806_v62 }
 0x2c8   :  { %v805_v60 = vsel %vm773_vm0, %v749_v54, %v789_v57 }
 0x2c9   :  { %v814_v61 = vpack.c.bf16 %v805_v60, %v804_v59  ;;  %1526 = vmatpush3.bf16.msra.mxu0 %v1596_v2 }
 0x2ca   :  { %1527 = vmatprep.subr.bf16.mxu0 %v1718_v1 }
 0x2cb   :  { %1517 = vmatprep.mubr.bf16.mxu1 %v814_v61 }
 0x2cc   :  { %1518 = vmatmul.mubr.bf16.gmra.mxu1 %v815_v63 }
 0x2cd   :  { %1528 = vmatpush3.bf16.msra.mxu0 %v1597_v3 }
 0x2ce   :  { %1529 = vmatprep.subr.bf16.mxu0 %v1718_v1 }
 0x2d1   :  { %1530 = vmatpush3.bf16.msra.mxu0 %v1598_v4 }
 0x2d2   :  { %1531 = vmatprep.subr.bf16.mxu0 %v1718_v1 }
 0x2d5   :  { %1532 = vmatpush3.bf16.msra.mxu0 %v1599_v5 }
 0x2d6   :  { %1533 = vmatprep.subr.bf16.mxu0 %v1718_v1 }
 0x2d9   :  { %1534 = vmatpush3.bf16.msra.mxu0 %v1600_v6 }
 0x2da   :  { %1535 = vmatprep.subr.bf16.mxu0 %v1718_v1 }
 0x2dd   :  { %1536 = vmatpush3.bf16.msra.mxu0 %v1601_v7 }
 0x2de   :  { %1541 = vmatprep.subr.bf16.mxu0 %v1718_v1 }
 0x374   :  { %v1507_v8 = vpop.f32.mrf.mxu1 }
 0x375   :  { %v930_v13 = vadd.f32 %v1507_v8, %v1990_v9 }
 0x376   :  { %v921_v10 = vpop.f32.mrf.mxu1 }
 0x377   :  { %v922_v11 = vadd.f32 %v1990_v9, %v921_v10  ;;  %v1002_v19 = vmul.f32 0.1, %v930_v13  ;;  %vm986_vm4 = vcmp.ge.f32.partialorder %v930_v13, 0.0 }
 0x378   :  { %v1508_v12 = vpop.f32.mrf.mxu1 }
 0x379   :  { %v1000_v15 = vmul.f32 0.1, %v922_v11  ;;  %v933_v16 = vadd.f32 %v1508_v12, %v1990_v9  ;;  %vm984_vm2 = vcmp.ge.f32.partialorder %v922_v11, 0.0  ;;  %v1018_v29 = vsel %vm986_vm4, %v930_v13, %v1002_v19 }
 0x37a   :  { %v924_v14 = vpop.f32.mrf.mxu1  ;;  %vm1206_vm4 = vcmask 261120  }
 0x37b   :  { %v925_v17 = vadd.f32 %v1990_v9, %v924_v14  ;;  %v1016_v22 = vsel %vm984_vm2, %v922_v11, %v1000_v15  ;;  %v1003_v23 = vmul.f32 0.1, %v933_v16  ;;  %vm987_vm5 = vcmp.ge.f32.partialorder %v933_v16, 0.0 }
 0x37c   :  { %v1511_v18 = vpop.f32.mrf.mxu1 }
 0x37d   :  { %vm985_vm3 = vcmp.ge.f32.partialorder %v925_v17, 0.0  ;;  %v1001_v20 = vmul.f32 0.1, %v925_v17  ;;  %v946_v30 = vadd.f32 %v1511_v18, %v1990_v9  ;;  %v1019_v34 = vsel %vm987_vm5, %v933_v16, %v1003_v23 }
 0x37e   :  { %v937_v21 = vpop.f32.mrf.mxu1 }
 0x37f   :  { %v1017_v24 = vsel %vm985_vm3, %v925_v17, %v1001_v20  ;;  %v938_v25 = vadd.f32 %v1990_v9, %v937_v21  ;;  %v1006_v38 = vmul.f32 0.1, %v946_v30  ;;  %vm990_vm8 = vcmp.ge.f32.partialorder %v946_v30, 0.0 }
 0x380   :  { %v1032_v27 = vadd.f32 %v1017_v24, %v1016_v22  ;;  %v1512_v28 = vpop.f32.mrf.mxu1  ;;  %vm1090_vm3 = vcmask 1041409  }
 0x381   :  { %v1004_v31 = vmul.f32 0.1, %v938_v25  ;;  %vm988_vm6 = vcmp.ge.f32.partialorder %v938_v25, 0.0  ;;  %v949_v35 = vadd.f32 %v1512_v28, %v1990_v9  ;;  %v1022_v49 = vsel %vm990_vm8, %v946_v30, %v1006_v38 }
 0x382   :  { %v1033_v32 = vadd.f32 %v1032_v27, %v1018_v29  ;;  %v940_v33 = vpop.f32.mrf.mxu1 }
 0x383   :  { %v941_v26 = vadd.f32 %v1990_v9, %v940_v33  ;;  %v1020_v39 = vsel %vm988_vm6, %v938_v25, %v1004_v31  ;;  %v1007_v44 = vmul.f32 0.1, %v949_v35  ;;  %vm991_vm9 = vcmp.ge.f32.partialorder %v949_v35, 0.0 }
 0x384   :  { %v1034_v36 = vadd.f32 %v1033_v32, %v1019_v34  ;;  %v1515_v37 = vpop.f32.mrf.mxu1 }
 0x385   :  { %vm989_vm7 = vcmp.ge.f32.partialorder %v941_v26, 0.0  ;;  %v1005_v40 = vmul.f32 0.1, %v941_v26  ;;  %v962_v50 = vadd.f32 %v1515_v37, %v1990_v9  ;;  %v1023_v53 = vsel %vm991_vm9, %v949_v35, %v1007_v44  ;;  %v1602_v44 = vld [vmem:[%s2034_s11 + $0x8] sm:$0xff]  }
 0x386   :  { %v1035_v41 = vadd.f32 %v1034_v36, %v1020_v39  ;;  %v953_v42 = vpop.f32.mrf.mxu1 }
 0x387   :  { %v1021_v45 = vsel %vm989_vm7, %v941_v26, %v1005_v40  ;;  %v954_v46 = vadd.f32 %v1990_v9, %v953_v42  ;;  %v1010_v59 = vmul.f32 0.1, %v962_v50  ;;  %vm994_vm12 = vcmp.ge.f32.partialorder %v962_v50, 0.0 }
 0x388   :  { %v1036_v47 = vadd.f32 %v1035_v41, %v1021_v45  ;;  %v1516_v48 = vpop.f32.mrf.mxu1 }
 0x389   :  { %v1008_v43 = vmul.f32 0.1, %v954_v46  ;;  %v965_v54 = vadd.f32 %v1516_v48, %v1990_v9  ;;  %vm992_vm10 = vcmp.ge.f32.partialorder %v954_v46, 0.0  ;;  %v1026_v5 = vsel %vm994_vm12, %v962_v50, %v1010_v59 }
 0x38a   :  { %v1037_v51 = vadd.f32 %v1036_v47, %v1022_v49  ;;  %v956_v52 = vpop.f32.mrf.mxu1  ;;  %v1316_v47 = vld [vmem:[#allocation8] ss:$0 sm:$0xff] }
 0x38b   :  { %v957_v56 = vadd.f32 %v1990_v9, %v956_v52  ;;  %v1024_v63 = vsel %vm992_vm10, %v954_v46, %v1008_v43  ;;  %v1011_v0 = vmul.f32 0.1, %v965_v54  ;;  %vm995_vm13 = vcmp.ge.f32.partialorder %v965_v54, 0.0  ;;  %v1603_v46 = vld [vmem:[%s2034_s11] sm:$0xff]   ;;  %s1684_s11 = scalar_lea.vmem %s1258_s20, 32 }
 0x38c   :  { %v1038_v57 = vadd.f32 %v1037_v51, %v1023_v53  ;;  %v1519_v58 = vpop.f32.mrf.mxu1  ;;  %v1325_v43 = vld [vmem:[%s2035_s12] ss:$0 sm:$0xff]  ;;  %p1685_p6 = scmp.ne.s32.totalorder %s1258_s20, %s1684_s11  ;;  %p1690_p8 = scmp.lt.s32.totalorder %s1684_s11, %s1684_s11 }
 0x38d   :  { %vm993_vm11 = vcmp.ge.f32.partialorder %v957_v56, 0.0  ;;  %v1009_v60 = vmul.f32 0.1, %v957_v56  ;;  %v978_v6 = vadd.f32 %v1519_v58, %v1990_v9  ;;  %v1027_v12 = vsel %vm995_vm13, %v965_v54, %v1011_v0 }
 0x38e   :  { %v1039_v61 = vrot.slane %v1038_v57, 4  ;;  %v969_v62 = vpop.f32.mrf.mxu1  ;;  %p1691_p9 = por %p1690_p8, %p1689_p7 }
 0x38f   :  { %v1025_v55 = vsel %vm993_vm11, %v957_v56, %v1009_v60  ;;  %v970_v2 = vadd.f32 %v1990_v9, %v969_v62  ;;  %v1014_v16 = vmul.f32 0.1, %v978_v6  ;;  %vm998_vm0 = vcmp.ge.f32.partialorder %v978_v6, 0.0 }
 0x390   :  { %v1045_v3 = vadd.f32 %v1025_v55, %v1024_v63  ;;  %v1520_v4 = vpop.f32.mrf.mxu1  ;;  %v1040_v8 = vadd.f32 %v1039_v61, %v1038_v57  ;;  %p1692_p10 = pnand %p1691_p9, %p1685_p6 }
 0x391   :  { %v1012_v7 = vmul.f32 0.1, %v970_v2  ;;  %vm996_vm14 = vcmp.ge.f32.partialorder %v970_v2, 0.0  ;;  %v981_v13 = vadd.f32 %v1520_v4, %v1990_v9  ;;  %v1030_v24 = vsel %vm998_vm0, %v978_v6, %v1014_v16 }
 0x392   :  { %v1046_v10 = vadd.f32 %v1045_v3, %v1026_v5  ;;  %v972_v11 = vpop.f32.mrf.mxu1  ;;  %v1041_v19 = vrot.slane %v1040_v8, 2 }
 0x393   :  { %v973_v14 = vadd.f32 %v1990_v9, %v972_v11  ;;  %v1028_v17 = vsel %vm996_vm14, %v970_v2, %v1012_v7  ;;  %v1015_v21 = vmul.f32 0.1, %v981_v13  ;;  %vm999_vm2 = vcmp.ge.f32.partialorder %v981_v13, 0.0 }
 0x394   :  { %v1047_v15 = vadd.f32 %v1046_v10, %v1027_v12  ;;  %v1042_v25 = vadd.f32 %v1041_v19, %v1040_v8 }
 0x395   :  { %vm997_vm15 = vcmp.ge.f32.partialorder %v973_v14, 0.0  ;;  %v1013_v18 = vmul.f32 0.1, %v973_v14  ;;  %v1031_v28 = vsel %vm999_vm2, %v981_v13, %v1015_v21 }
 0x396   :  { %v1048_v20 = vadd.f32 %v1047_v15, %v1028_v17  ;;  %v1043_v30 = vrot.slane %v1042_v25, 1 }
 0x397   :  { %v1029_v22 = vsel %vm997_vm15, %v973_v14, %v1013_v18 }
 0x398   :  { %v1049_v23 = vadd.f32 %v1048_v20, %v1029_v22  ;;  %v1044_v32 = vadd.f32 %v1043_v30, %v1042_v25 }
 0x39a   :  { %v1050_v27 = vadd.f32 %v1049_v23, %v1030_v24  ;;  %v1059_v35 = vmul.f32 0.015625, %v1044_v32 }
 0x39c   :  { %v1051_v29 = vadd.f32 %v1050_v27, %v1031_v28  ;;  %v1061_v37 = vpack.c.bf16 %v1059_v35, %v1059_v35 }
 0x39e   :  { %v1052_v31 = vrot.slane %v1051_v29, 4  ;;  %v1088_v40 = vunpack.c.l.b16 %v1061_v37 }
 0x3a0   :  { %v1053_v9 = vadd.f32 %v1052_v31, %v1051_v29 }
 0x3a2   :  { %v1054_v33 = vrot.slane %v1053_v9, 2 }
 0x3a4   :  { %v1055_v34 = vadd.f32 %v1054_v33, %v1053_v9 }
 0x3a6   :  { %v1056_v26 = vrot.slane %v1055_v34, 1 }
 0x3a8   :  { %v1057_v36 = vadd.f32 %v1056_v26, %v1055_v34 }
 0x3aa   :  { %v1060_v38 = vmul.f32 0.015625, %v1057_v36 }
 0x3ac   :  { %v1062_v39 = vpack.c.bf16 %v1060_v38, %v1060_v38 }
 0x3ae   :  { %v1089_v41 = vunpack.c.l.b16 %v1062_v39 }
 0x3b0   :  { %v1091_v42 = vsel %vm1090_vm3, %v1089_v41, %v1088_v40 }
 0x3b1   :  { %v1092_v45 = vpack.c.b16 %v1091_v42, %v1091_v42 }
 0x3b3   :  { %1538 = vmatmul.mubr.bf16.vlgmr.msra.gmra.mxu0 %v1092_v45 }
 0x3b4   :  { %1542 = vmatpush3.bf16.msra.mxu0 %v1602_v44  ;;  %1545 = vmatprep.mubr.msk.bf16.mxu0 %vm1719_vm1, %v1718_v1 }
 0x3b5   :  { %1543 = vmatprep.subr.bf16.mxu0 %v1718_v1 }
 0x3b8   :  { %1544 = vmatpush3.bf16.msra.mxu0 %v1603_v46 }
 0x473   :  { %v1176_v48 = vpop.f32.mrf.mxu0 }
 0x474   :  { %v1177_v49 = vadd.f32 %v1316_v47, %v1176_v48 }
 0x475   :  { %v1539_v50 = vpop.f32.mrf.mxu0 }
 0x476   :  { %v1182_v51 = vpack.c.bf16 %v1177_v49, %v1177_v49 }
 0x477   :  { %v1179_v52 = vpop.f32.mrf.mxu0 }
 0x478   :  { %1546 = vmatmul.mubr.msk.bf16.vlgmr.msra.gmra.mxu0 %vm1206_vm4, %v1182_v51 }
 0x479   :  { %v1540_v53 = vpop.f32.mrf.mxu0 }
 0x538   :  { %v1244_v1 = vpop.f32.mrf.mxu0 }
 0x539   :  { %v1245_v54 = vadd.f32 %v1325_v43, %v1244_v1 }
 0x53a   :  { %v1547_v56 = vpop.f32.mrf.mxu0 }
 0x53b   :  { %1250 = vst [vmem:[#allocation10] sm:$0x3] %v1245_v54 }
 0x53c   :  { %v1247_v57 = vpop.f32.mrf.mxu0 }
 0x53d   :  { %1695 = shalt.err (!%p1692_p10)
}
 0x53e   :  { %1260 = dma.vmem_to_hbm [thread:$0]  %s1258_s20, 32, %s2036_s13, [#allocation4]   ;;  %v1548_v58 = vpop.f32.mrf.mxu0 }
 0x53f   :  { %1710 = dma.done.wait [#allocation4], 32  }
 0x540   :  { %1711 = vsyncadd [#allocation4], 4294967264 }
 0x541   :  { %1264 = vsyncpa [#allocation3], 1 }
 0x542   :  { %1265 = vsyncpa [#allocation6], 1 }
 0x543   :  { %1266 = vsyncpa [#allocation9], 1 }
 0x544   :  { %1267 = vsyncpa [#allocation4], 1 }

</bundles_post_ra>
